<compile_context>
chip_gen: v7x
topology: tpu7x:2x2x1
jax: 0.10.0
libtpu: 0.0.40
codegen_flags: <defaults>
</compile_context>

<pallas_src>
import functools

import jax
import jax.numpy as jnp
from jax.experimental import pallas as pl
from jax.experimental.pallas import tpu as pltpu


def _tv_partial_kernel(x_ref, o_ref, *, p: int):
    """x_ref: (tile_b, H, W) block of images.  o_ref: (1, 8, 128) partial-sum slab."""
    a = x_ref[...].astype(jnp.float32)

    # Forward differences over the valid positions only (the PyTorch helper
    # zero-pads the last column/row, which contributes nothing to the sums).
    dx = a[:, :, 1:] - a[:, :, :-1]        # (tile_b, H, W-1)
    dy = a[:, 1:, :] - a[:, :-1, :]        # (tile_b, H-1, W)

    if p == 1:
        partial = jnp.sum(jnp.abs(dx)) + jnp.sum(jnp.abs(dy))
    else:
        partial = jnp.sum(dx * dx) + jnp.sum(dy * dy)

    # Each grid step owns its own lane-dense output slab; put the scalar at
    # [0, 0, 0] and zeros elsewhere (summed in the JAX epilogue).
    sub = jax.lax.broadcasted_iota(jnp.int32, (1, 8, 128), 1)
    lane = jax.lax.broadcasted_iota(jnp.int32, (1, 8, 128), 2)
    o_ref[...] = jnp.where((sub == 0) & (lane == 0), partial, jnp.float32(0.0))


def _largest_divisor_at_most(n: int, cap: int) -> int:
    cap = max(1, min(cap, n))
    for d in range(cap, 0, -1):
        if n % d == 0:
            return d
    return 1


def tv_grad_power_sum(x, *, p: int = 2,
                      target_block_bytes: int = 8 * 1024 * 1024,
                      vmem_limit_bytes: int = 32 * 1024 * 1024):
    """sum(|dx|^p) + sum(|dy|^p) over forward differences along the last two axes."""
    *lead, h, w = x.shape
    nc = 1
    for d in lead:
        nc *= d
    x3 = x.reshape(nc, h, w)               # free, contiguous reshape (no HBM copy)

    itemsize = jnp.dtype(x.dtype).itemsize
    img_bytes = h * w * itemsize
    max_tile = max(1, target_block_bytes // img_bytes)
    tile_b = _largest_divisor_at_most(nc, max_tile)
    if tile_b == nc and nc > 1:
        # Keep at least 2 grid blocks so v7x can spread them over both TensorCores.
        tile_b = _largest_divisor_at_most(nc, nc // 2)
    # TODO(synk): a single (1, H, W) image larger than the VMEM budget would need
    # H-dimension tiling with a one-row halo; not implemented here.
    grid_g = nc // tile_b

    kernel = functools.partial(_tv_partial_kernel, p=p)

    partials = pl.pallas_call(
        kernel,
        out_shape=jax.ShapeDtypeStruct((grid_g, 8, 128), jnp.float32),
        grid_spec=pltpu.PrefetchScalarGridSpec(
            num_scalar_prefetch=0,
            grid=(grid_g,),
            in_specs=[pl.BlockSpec((tile_b, h, w), lambda i: (i, 0, 0))],
            out_specs=pl.BlockSpec((1, 8, 128), lambda i: (i, 0, 0)),
        ),
        compiler_params=pltpu.CompilerParams(
            dimension_semantics=("parallel",),
            vmem_limit_bytes=vmem_limit_bytes,
        ),
    )(x3)

    return jnp.sum(partials)


def get_outnorm(shape, out_norm: str = '') -> float:
    """Python mirror of the module's get_outnorm (operates on a static shape)."""
    if not out_norm:
        return 1.0
    norm = 1.0
    if 'b' in out_norm:
        norm /= shape[0]
    if 'c' in out_norm:
        norm /= shape[-3]
    if 'i' in out_norm:
        norm /= shape[-1] * shape[-2]
    return norm


def tv_loss(x, *, tv_type: str = 'tv', p=2, reduction: str = 'mean',
            out_norm: str = 'b', beta: int = 2):
    """Pallas-backed equivalent of TVLoss.forward (regular 'tv' type)."""
    if isinstance(p, str):
        p = 1 if '1' in p else 2
    if p not in (1, 2):
        raise ValueError(f'Expected p value to be 1 or 2, but got {p}')
    if tv_type.lower() in ('dtv', '4d'):
        # TODO(synk): 4D directional TV (diagonal gradients) not implemented.
        raise NotImplementedError("tv_type='dtv' is not implemented")

    if x.ndim == 3:
        n = 1
        c, h, w = x.shape
    elif x.ndim == 4:
        n, c, h, w = x.shape
    else:
        raise ValueError(f'Expected input tensor ndim 3 or 4, got {x.ndim}')

    total = tv_grad_power_sum(x, p=p)      # f32 scalar: sum|dx|^p + sum|dy|^p

    # Per-image reductions share the same denominator, so both 'mean' and 'sum'
    # (followed by the batch .sum()/.mean()) collapse onto the global sum.
    loss = total
    if reduction != 'sum':
        loss = loss / jnp.float32(c * h * w)   # per-image mean incl. zero padding
    if 'b' not in out_norm:
        loss = loss / jnp.float32(n)           # .mean() over the batch instead of .sum()
    if beta != 2:
        loss = loss ** (beta / 2)
    return loss * jnp.float32(get_outnorm(x.shape, out_norm))


def _reference_tv_loss(x, *, p=2, reduction='mean', out_norm='b', beta=2):
    """Pure-JAX mirror of the PyTorch TVLoss (tv_type='tv') for verification."""
    dx = x[..., :, 1:] - x[..., :, :-1]
    dy = x[..., 1:, :] - x[..., :-1, :]
    pad_w = [(0, 0)] * (x.ndim - 1) + [(0, 1)]
    pad_h = [(0, 0)] * (x.ndim - 2) + [(0, 1), (0, 0)]
    dx = jnp.pad(dx, pad_w)
    dy = jnp.pad(dy, pad_h)
    red = jnp.sum if reduction == 'sum' else jnp.mean
    axes = (-3, -2, -1) if x.ndim == 4 else None
    loss = 0.0
    for g in (dx, dy):
        v = jnp.abs(g) if p == 1 else g * g
        loss = loss + red(v, axis=axes)
    loss = jnp.sum(loss) if 'b' in out_norm else jnp.mean(loss)
    if beta != 2:
        loss = loss ** (beta / 2)
    return loss * get_outnorm(x.shape, out_norm)


if __name__ == "__main__":
    key = jax.random.PRNGKey(0)
    x = jax.random.normal(key, (2, 4, 16, 16), dtype=jnp.float32)

    loss = tv_loss(x)                      # module defaults: 'tv', p=2, 'mean', 'b', beta=2
    jax.block_until_ready(loss)

    ref = _reference_tv_loss(x)
    assert jnp.allclose(loss, ref, atol=1e-5, rtol=1e-5), (loss, ref)

    print("KERNEL_OK")
</pallas_src>

<mosaic_0001>
module attributes {stable_mosaic.version = 11 : i64} {
  func.func @_tv_partial_kernel(%arg0: i32, %arg1: memref<4x16x16xf32, #tpu.memory_space<vmem>>, %arg2: memref<1x8x128xf32, #tpu.memory_space<vmem>>) attributes {dimension_semantics = [#tpu.dimension_semantics<parallel>], iteration_bounds = array<i64: 2>, scalar_prefetch = 0 : i64, scratch_operands = 0 : i64, tpu.core_type = #tpu.core_type<tc>, window_params = [{transform_indices = @transform_0, window_bounds = array<i64: 4, 16, 16>}, {transform_indices = @transform_1, window_bounds = array<i64: 1, 8, 128>}]} {
    %c0 = arith.constant 0 : index
    %c0_0 = arith.constant 0 : index
    %c0_1 = arith.constant 0 : index
    %0 = vector.load %arg1[%c0, %c0_0, %c0_1] : memref<4x16x16xf32, #tpu.memory_space<vmem>>, vector<4x16x16xf32>
    %1 = vector.extract_strided_slice %0 {offsets = [0, 0, 1], sizes = [4, 16, 15], strides = [1, 1, 1]} : vector<4x16x16xf32> to vector<4x16x15xf32>
    %2 = vector.extract_strided_slice %0 {offsets = [0, 0, 0], sizes = [4, 16, 15], strides = [1, 1, 1]} : vector<4x16x16xf32> to vector<4x16x15xf32>
    %3 = arith.subf %1, %2 : vector<4x16x15xf32>
    %4 = vector.extract_strided_slice %0 {offsets = [0, 1, 0], sizes = [4, 15, 16], strides = [1, 1, 1]} : vector<4x16x16xf32> to vector<4x15x16xf32>
    %5 = vector.extract_strided_slice %0 {offsets = [0, 0, 0], sizes = [4, 15, 16], strides = [1, 1, 1]} : vector<4x16x16xf32> to vector<4x15x16xf32>
    %6 = arith.subf %4, %5 : vector<4x15x16xf32>
    %7 = arith.mulf %3, %3 : vector<4x16x15xf32>
    %8 = vector.shape_cast %7 : vector<4x16x15xf32> to vector<1x4x16x15xf32>
    %cst = arith.constant dense<0.000000e+00> : vector<1xf32>
    %9 = vector.multi_reduction <add>, %8, %cst [1, 2, 3] : vector<1x4x16x15xf32> to vector<1xf32>
    %10 = vector.shape_cast %9 : vector<1xf32> to vector<1x1x1x1xf32>
    %11 = vector.extract %10[0, 0, 0, 0] : f32 from vector<1x1x1x1xf32>
    %12 = arith.mulf %6, %6 : vector<4x15x16xf32>
    %13 = vector.shape_cast %12 : vector<4x15x16xf32> to vector<1x4x15x16xf32>
    %cst_2 = arith.constant dense<0.000000e+00> : vector<1xf32>
    %14 = vector.multi_reduction <add>, %13, %cst_2 [1, 2, 3] : vector<1x4x15x16xf32> to vector<1xf32>
    %15 = vector.shape_cast %14 : vector<1xf32> to vector<1x1x1x1xf32>
    %16 = vector.extract %15[0, 0, 0, 0] : f32 from vector<1x1x1x1xf32>
    %17 = arith.addf %11, %16 : f32
    %18 = tpu.iota {dimensions = array<i32: 1>} : vector<1x8x128xi32>
    %19 = tpu.iota {dimensions = array<i32: 2>} : vector<1x8x128xi32>
    %c0_i32 = arith.constant 0 : i32
    %20 = vector.broadcast %c0_i32 : i32 to vector<1x8x128xi32>
    %21 = arith.cmpi eq, %18, %20 : vector<1x8x128xi32>
    %c0_i32_3 = arith.constant 0 : i32
    %22 = vector.broadcast %c0_i32_3 : i32 to vector<1x8x128xi32>
    %23 = arith.cmpi eq, %19, %22 : vector<1x8x128xi32>
    %24 = arith.andi %21, %23 : vector<1x8x128xi1>
    %cst_4 = arith.constant 0.000000e+00 : f32
    %25 = vector.broadcast %17 : f32 to vector<1x8x128xf32>
    %26 = vector.broadcast %cst_4 : f32 to vector<1x8x128xf32>
    %27 = arith.select %24, %25, %26 : vector<1x8x128xi1>, vector<1x8x128xf32>
    %c0_5 = arith.constant 0 : index
    %c0_6 = arith.constant 0 : index
    %c0_7 = arith.constant 0 : index
    %28 = vector.load %arg2[%c0_5, %c0_6, %c0_7] : memref<1x8x128xf32, #tpu.memory_space<vmem>>, vector<1x8x128xf32>
    tpu.vector_store %arg2[%c0_5, %c0_6, %c0_7], %27 {strides = array<i32>} : memref<1x8x128xf32, #tpu.memory_space<vmem>>, vector<1x8x128xf32>,
    return
  }
  func.func @transform_0(%arg0: i32) -> (i32, i32, i32) {
    %c0_i32 = arith.constant 0 : i32
    %c0_i32_0 = arith.constant 0 : i32
    %c0_i32_1 = arith.constant 0 : i32
    return %arg0, %c0_i32, %c0_i32_0 : i32, i32, i32
  }
  func.func @transform_1(%arg0: i32) -> (i32, i32, i32) {
    %c0_i32 = arith.constant 0 : i32
    %c0_i32_0 = arith.constant 0 : i32
    %c0_i32_1 = arith.constant 0 : i32
    return %arg0, %c0_i32, %c0_i32_0 : i32, i32, i32
  }
}

</mosaic_0001>

<bundles_post_ra>
// kernel: tpu_custom_call.1
= control target key start
LH: loop header
LB: loop body
LE: loop exit
PB: predicated region body
PF: predicated region fallthrough
CT: control target
= control target key end

     0   :  { %6 = vsyncpa [#allocation3], 0  ;;  %s838_s0 = inlined_call_operand.hbm [shape: f32[8,16,16], index: 0, kind: input, shape index: {}]   ;;  %s839_s1 = inlined_call_operand.hbm [shape: f32[2,8,128], index: 1, kind: output, shape index: {}]  }
   0x1   :  { %8 = vsyncpa [#allocation3 + $0x1], 0 }
   0x2   :  { %9 = vsyncpa [#allocation4], 0 }
   0x3   :  { %11 = vsyncpa [#allocation4 + $0x1], 0  ;;  %s621_s6 = smov 0   ;;  %s623_s7 = smov 0  }
   0x4   :  { %s625_s8 = smov 0   ;;  %s627_s9 = smov 0  }
   0x5 LB: > { %s642_s10 = sadd.s32 4294967295, %s603_s9   ;;  %s437_s11 = sadd.s32 4294967294, %s603_s9   ;;  %s603_s9 = sphi %s627_s9, %s852_s9   ;;  %s599_s8 = sphi %s625_s8, %s851_s8   ;;  %s595_s7 = sphi %s623_s7, %s850_s7   ;;  %s591_s6 = sphi %s621_s6, %s849_s6  }
   0x6   : > { %s646_s12 = sadd.s32 1, %s603_s9   ;;  %s24_s13 = sadd.s32 1, %s599_s8 }
   0x7   : > { %s21_s14 = ssub.s32 %s603_s9, %s646_s12  ;;  %p31_p0 = scmp.ne.s32.totalorder %s599_s8, %s595_s7 }
   0x8   : > { %p22_p1 = scmp.eq.s32.totalorder %s21_s14, 0  ;;  %p32_p2 = scmp.eq.s32.totalorder %s603_s9, 0 }
   0x9   : > { %p37_p3 = scmp.ne.s32.totalorder %s595_s7, %s591_s6  ;;  %p38_p4 = scmp.eq.s32.totalorder %s642_s10, 0 }
   0xa   : > { %s658_s15 = scalar_select %p22_p1, %s599_s8, %s24_s13  }
   0xb   : > { %p660_p5 = por %p32_p2, %p31_p0  ;;  %p664_p6 = por %p38_p4, %p37_p3 }
   0xc   : > { %p61_p7 = scmp.eq.s32.totalorder %s642_s10, 1  ;;  %p67_p8 = scmp.eq.s32.totalorder %s437_s11, 1 }
   0xd   : > { %p469_p10 = scmp.lt.s32.totalorder %s603_s9, 2  ;;  %s87_s20 = sand.u32 1, %s599_s8  }
   0xe   : > { %p671_p11 = por %p61_p7, %p31_p0  ;;  %p675_p12 = por %p67_p8, %p37_p3 }
   0xf   : > { %s452_s21 = sshll.u32 %s603_s9, 10  ;;  %s440_s22 = sshll.u32 %s87_s20, 6 }
  0x10   : > { %s843_s18 = scalar_select %p671_p11, 1, 0 }
  0x11   : > { %s844_s19 = scalar_select %p675_p12, 1, 0 }
  0x12   : > { %s684_s25 = scalar_lea.hbm %s838_s0, %s452_s21  ;;  %s91_s26 = scalar_lea.vmem [#allocation2], %s440_s22 }
  0x13   : > { %s99_s27 = sshll.u32 %s91_s26, 4  ;;  %p688_p13 = pnand %p469_p10, %p660_p5  ;;  %s692_s27 = int_to_ptr.vmem [resolvable:$true] %s99_s27 }
  0x14   : > { %s694_s29 = scalar_lea.sflag [#allocation3], %s87_s20  ;;  %s507_s30 = scalar_lea.hbm %s684_s25, 1024 }
  0x15   : > { %p508_p0 = scmp.ne.s32.totalorder %s684_s25, %s507_s30  ;;  %p509_p1 = pneg %p688_p13 }
  0x16   : > { %s512_s4 = scalar_lea.hbm %s838_s0, 2048  ;;  %p513_p4 = scmp.lt.u32.totalorder %s684_s25, %s838_s0 }
  0x17   : > { %p510_p2 = pnand %p509_p1, %p508_p0  ;;  %p514_p5 = scmp.lt.u32.totalorder %s512_s4, %s507_s30 }
  0x18   : > { %p516_p8 = scmp.lt.u32.totalorder %s507_s30, %s684_s25 }
  0x19   : > { %p511_p3 = pneg %p510_p2  ;;  %p515_p7 = por %p514_p5, %p513_p4 }
  0x1b   : > { %p517_p10 = por %p516_p8, %p515_p7 }
  0x1d   : > { %p518_p9 = pnand %p517_p10, %p511_p3 }
  0x1f   : > { %521 = shalt.err (!%p518_p9)
}
  0x20   : > { %s522_s13 = scalar_lea.vmem %s692_s27, 1024  ;;  %s605_s14 = smov [#allocation2]  }
  0x21   : > { %p523_p0 = scmp.ne.s32.totalorder %s692_s27, %s522_s13  ;;  %s527_s16 = sshll.u32 %s605_s14, 4  ;;  %s528_s16 = int_to_ptr.vmem [resolvable:$false] %s527_s16 }
  0x22   : > { %s529_s20 = scalar_lea.vmem %s528_s16, 2048  ;;  %p530_p11 = scmp.lt.s32.totalorder %s692_s27, %s528_s16 }
  0x23   : > { %p525_p2 = pnand %p523_p0, %p509_p1  ;;  %p531_p4 = scmp.lt.s32.totalorder %s529_s20, %s522_s13 }
  0x25   : > { %p526_p12 = pneg %p525_p2  ;;  %p532_p5 = por %p531_p4, %p530_p11 }
  0x27   : > { %p533_p7 = pnand %p532_p5, %p526_p12 }
  0x29   : > { %536 = shalt.err (!%p533_p7)
}
  0x2a   : > { %s606_s21 = smov 128   ;;  %s607_s22 = smov 8  }
  0x2b   : > { %464 = dma.hbm_to_vmem [thread:$0]  (!%p688_p13), %s684_s25, 1024, %s692_s27, %s694_s29, %s606_s21, %s606_s21, %s607_s22  }
  0x2c   : > { %p444_p9 = scmp.ge.s32.totalorder %s603_s9, 1  ;;  %p107_p1 = scmp.lt.s32.totalorder %s603_s9, 3 }
  0x2e   : > { %p108_p3 = pnand %p444_p9, %p107_p1 }
  0x2f   : > { %s725_s23 = sand.u32 (!%p108_p3), 1, %s595_s7  }
  0x30   : > { %111 = sbr.rel (%p108_p3) target bundleno = 533 (0x215), region = 24  ;;  %s445_s24 = sshll.u32 (!%p108_p3), %s725_s23, 6 }
  0x31   : > { %s114_s26 = scalar_lea.sflag (!%p108_p3), [#allocation3], %s725_s23  ;;  %s117_s30 = scalar_lea.vmem (!%p108_p3), [#allocation2], %s445_s24 }
  0x37   : > { %582 = dma.done.wait (%p664_p6), %s114_s26, 1024  }
  0x38   : > { %584 = vsyncadd (%p664_p6), %s114_s26, 4294966272  ;;  %v137_v0 = vld [vmem:[%s117_s30] sm:$0xff]  ;;  %v139_v1 = vld [vmem:[%s117_s30 + $0x10] sm:$0xff]  ;;  %s608_s25 = smov 1   ;;  %vm185_vm0 = vcmask 1040384   ;;  %s609_s17 = smov 127  }
  0x39   : > { %153 = vrot.lane.b32.xlu0 %v137_v0, %s608_s25  ;;  %157 = vrot.lane.b32.xlu1 %v139_v1, %s608_s25  ;;  %v138_v2 = vld [vmem:[%s117_s30 + $0x8] sm:$0xff]  ;;  %v140_v3 = vld [vmem:[%s117_s30 + $0x18] sm:$0xff]  ;;  %v186_v13 = vrot.slane %v137_v0, 7  ;;  %v189_v21 = vrot.slane %v139_v1, 7  ;;  %vm295_vm1 = vcmask 1046528   ;;  %vm316_vm2 = vcmask 130048  }
  0x3a   : > { %v733_v4 = vld [vmem:[%s117_s30 + $0x20] sm:$0xff]  ;;  %v735_v5 = vld [vmem:[%s117_s30 + $0x28] sm:$0xff]  ;;  %v739_v6 = vld [vmem:[%s117_s30 + $0x30] sm:$0xff]  ;;  %v187_v14 = vrot.slane %v138_v2, 7  ;;  %v190_v23 = vrot.slane %v140_v3, 7  ;;  %vm318_vm3 = vcmask 129024  }
  0x3b   : > { %v741_v7 = vld [vmem:[%s117_s30 + $0x38] sm:$0xff]  ;;  %v206_v29 = vsub.f32 %v137_v0, %v186_v13  ;;  %v208_v38 = vsub.f32 %v139_v1, %v189_v21  ;;  %v192_v39 = vrot.slane %v733_v4, 7  ;;  %v193_v40 = vrot.slane %v735_v5, 7  ;;  %s446_s27 = sshll.u32 %s725_s23, 3  ;;  %s448_s29 = sshll.u32 %s642_s10, 7 }
  0x3c   : > { %v188_v22 = vsel %vm185_vm0, %v186_v13, %v187_v14  ;;  %v191_v32 = vsel %vm185_vm0, %v189_v21, %v190_v23  ;;  %v195_v56 = vrot.slane %v739_v6, 7  ;;  %v196_v57 = vrot.slane %v741_v7, 7  ;;  %s135_s3 = scalar_lea.vmem [#allocation5], %s446_s27  ;;  %s794_s14 = scalar_lea.hbm %s839_s1, %s448_s29 }
  0x3d   : > { %155 = vrot.lane.b32.xlu0 %v138_v2, %s608_s25  ;;  %159 = vrot.lane.b32.xlu1 %v140_v3, %s608_s25  ;;  %v207_v30 = vsub.f32 %v138_v2, %v188_v22  ;;  %v279_v41 = vmul.f32 %v206_v29, %v206_v29  ;;  %v209_v43 = vsub.f32 %v140_v3, %v191_v32  ;;  %vm254_vm4 = vcmask 121856   ;;  %s367_s4 = sshll.u32 %s135_s3, 4  ;;  %s354_s16 = scalar_lea.sflag [#allocation4], %s725_s23  ;;  %s796_s4 = int_to_ptr.vmem [resolvable:$true] %s367_s4 }
  0x3e   : > { %v281_v46 = vmul.f32 %v208_v38, %v208_v38  ;;  %v194_v50 = vsel %vm185_vm0, %v192_v39, %v193_v40  ;;  %v210_v52 = vsub.f32 %v733_v4, %v192_v39  ;;  %v197_v63 = vsel %vm185_vm0, %v195_v56, %v196_v57  ;;  %s537_s10 = scalar_lea.vmem %s796_s4, 128  ;;  %p846_p11 = scmp.ne.s32.totalorder %s843_s18, 0 }
  0x3f   : > { %v280_v42 = vmul.f32 %v207_v30, %v207_v30  ;;  %v296_v47 = vrot.slane %v279_v41, 1  ;;  %v282_v49 = vmul.f32 %v209_v43, %v209_v43  ;;  %v211_v53 = vsub.f32 %v735_v5, %v194_v50  ;;  %p538_p6 = scmp.ne.s32.totalorder %s796_s4, %s537_s10  ;;  %s610_s20 = smov [#allocation5]  }
  0x40   : > { %v299_v51 = vrot.slane %v281_v46, 1  ;;  %v283_v60 = vmul.f32 %v210_v52, %v210_v52  ;;  %s541_s21 = sshll.u32 %s610_s20, 4  ;;  %s542_s21 = int_to_ptr.vmem [resolvable:$false] %s541_s21 }
  0x41   : > { %161 = vrot.lane.b32.xlu0 %v733_v4, %s608_s25  ;;  %163 = vrot.lane.b32.xlu1 %v735_v5, %s608_s25  ;;  %v297_v48 = vrot.slane %v280_v42, 1  ;;  %v300_v54 = vrot.slane %v282_v49, 1  ;;  %v284_v61 = vmul.f32 %v211_v53, %v211_v53  ;;  %p539_p12 = pnand %p538_p6, %p846_p11  ;;  %s543_s22 = scalar_lea.vmem %s542_s21, 256 }
  0x42   : > { %p544_p8 = scmp.lt.s32.totalorder %s796_s4, %s542_s21  ;;  %p545_p10 = scmp.lt.s32.totalorder %s543_s22, %s537_s10 }
  0x43   : > { %v298_v55 = vsel %vm295_vm1, %v296_v47, %v297_v48  ;;  %v319_v59 = vsel %vm318_vm3, %v297_v48, 0.0  ;;  %v301_v62 = vsel %vm295_vm1, %v299_v51, %v300_v54  ;;  %p540_p13 = pneg %p539_p12 }
  0x44   : > { %v317_v58 = vsel %vm316_vm2, %v298_v55, 0.0  ;;  %p546_p0 = por %p545_p10, %p544_p8 }
  0x45   : > { %165 = vrot.lane.b32.xlu0 %v739_v6, %s608_s25  ;;  %167 = vrot.lane.b32.xlu1 %v741_v7, %s608_s25 }
  0x46   : > { %p547_p2 = pnand %p546_p0, %p540_p13 }
  0xab   : > { %v154_v8 = vpop.permute.xlu0 %153  ;;  %v158_v9 = vpop.permute.xlu1 %157 }
  0xac   : > { %v177_v10 = vsub.f32 %v137_v0, %v154_v8  ;;  %v179_v11 = vsub.f32 %v139_v1, %v158_v9  ;;  %v320_v0 = vadd.f32 %v319_v59, %v317_v58  ;;  %v321_v1 = vsel %vm316_vm2, %v301_v62, 0.0 }
  0xad   : > { %v323_v9 = vsel %vm318_vm3, %v300_v54, 0.0 }
  0xae   : > { %v214_v12 = vmul.f32 %v177_v10, %v177_v10  ;;  %v216_v17 = vmul.f32 %v179_v11, %v179_v11  ;;  %v322_v8 = vadd.f32 %v321_v1, %v320_v0 }
  0xaf   : > { %v156_v15 = vpop.permute.xlu0 %155  ;;  %v160_v16 = vpop.permute.xlu1 %159 }
  0xb0   : > { %v178_v18 = vsub.f32 %v138_v2, %v156_v15  ;;  %230 = vrot.lane.b32.xlu0 %v214_v12, %s609_s17  ;;  %v180_v19 = vsub.f32 %v140_v3, %v160_v16  ;;  %v302_v2 = vrot.slane %v283_v60, 1  ;;  %v212_v3 = vsub.f32 %v739_v6, %v195_v56 }
  0xb1   : > { %v324_v13 = vadd.f32 %v323_v9, %v322_v8  ;;  %v343_v60 = vlaneseq }
  0xb2   : > { %v215_v20 = vmul.f32 %v178_v18, %v178_v18  ;;  %v217_v26 = vmul.f32 %v180_v19, %v180_v19  ;;  %v285_v10 = vmul.f32 %v212_v3, %v212_v3 }
  0xb3   : > { %v162_v24 = vpop.permute.xlu0 %161  ;;  %v164_v25 = vpop.permute.xlu1 %163  ;;  %v346_v62 = vand.u32 127, %v343_v60 }
  0xb4   : > { %234 = vrot.lane.b32.xlu0 %v216_v17, %s609_s17  ;;  %232 = vrot.lane.b32.xlu1 %v215_v20, %s609_s17  ;;  %v181_v27 = vsub.f32 %v733_v4, %v162_v24  ;;  %v182_v28 = vsub.f32 %v735_v5, %v164_v25  ;;  %v213_v4 = vsub.f32 %v741_v7, %v197_v63  ;;  %v303_v5 = vrot.slane %v284_v61, 1 }
  0xb5   : > { %v305_v15 = vrot.slane %v285_v10, 1  ;;  %v344_v61 = vshrl.u32 %v343_v60, 7  ;;  %vm348_vm6 = vcmp.eq.s32.totalorder %v346_v62, 0 }
  0xb6   : > { %v218_v31 = vmul.f32 %v181_v27, %v181_v27  ;;  %v219_v35 = vmul.f32 %v182_v28, %v182_v28  ;;  %v286_v11 = vmul.f32 %v213_v4, %v213_v4  ;;  %v304_v12 = vsel %vm295_vm1, %v302_v2, %v303_v5 }
  0xb7   : > { %v166_v33 = vpop.permute.xlu0 %165  ;;  %v168_v34 = vpop.permute.xlu1 %167  ;;  %v325_v14 = vsel %vm316_vm2, %v304_v12, 0.0  ;;  %v327_v18 = vsel %vm318_vm3, %v303_v5, 0.0  ;;  %vm347_vm5 = vcmp.eq.s32.totalorder %v344_v61, 0 }
  0xb8   : > { %236 = vrot.lane.b32.xlu1 %v217_v26, %s609_s17  ;;  %v183_v36 = vsub.f32 %v739_v6, %v166_v33  ;;  %238 = vrot.lane.b32.xlu0 %v218_v31, %s609_s17  ;;  %v184_v37 = vsub.f32 %v741_v7, %v168_v34  ;;  %v306_v16 = vrot.slane %v286_v11, 1  ;;  %v326_v17 = vadd.f32 %v325_v14, %v324_v13  ;;  %vm349_vm7 = vmand %vm347_vm5, %vm348_vm6 }
  0xba   : > { %v220_v44 = vmul.f32 %v183_v36, %v183_v36  ;;  %v221_v45 = vmul.f32 %v184_v37, %v184_v37  ;;  %v307_v6 = vsel %vm295_vm1, %v305_v15, %v306_v16  ;;  %v328_v19 = vadd.f32 %v327_v18, %v326_v17 }
  0xbb   : > { %v329_v7 = vsel %vm316_vm2, %v307_v6, 0.0  ;;  %v331_v21 = vsel %vm318_vm3, %v306_v16, 0.0 }
  0xbc   : > { %240 = vrot.lane.b32.xlu1 %v219_v35, %s609_s17  ;;  %242 = vrot.lane.b32.xlu0 %v220_v44, %s609_s17  ;;  %v330_v20 = vadd.f32 %v329_v7, %v328_v19 }
  0xbe   : > { %v332_v22 = vadd.f32 %v331_v21, %v330_v20 }
  0xc0   : > { %244 = vrot.lane.b32.xlu1 %v221_v45, %s609_s17 }
  0xe4   : > { %333 = vadd.xlane.f32.xlu1 %v332_v22 }
 0x122   : > { %v231_v23 = vpop.permute.xlu0 %230 }
 0x123   : > { %v255_v26 = vsel %vm254_vm4, %v231_v23, 0.0 }
 0x126   : > { %v233_v24 = vpop.permute.xlu1 %232  ;;  %v235_v25 = vpop.permute.xlu0 %234 }
 0x127   : > { %v256_v27 = vsel %vm254_vm4, %v233_v24, 0.0  ;;  %v258_v29 = vsel %vm254_vm4, %v235_v25, 0.0 }
 0x128   : > { %v257_v28 = vadd.f32 %v256_v27, %v255_v26 }
 0x12a   : > { %v259_v30 = vadd.f32 %v258_v29, %v257_v28  ;;  %v237_v31 = vpop.permute.xlu1 %236  ;;  %v239_v32 = vpop.permute.xlu0 %238 }
 0x12b   : > { %v260_v33 = vsel %vm254_vm4, %v237_v31, 0.0  ;;  %v262_v34 = vsel %vm254_vm4, %v239_v32, 0.0 }
 0x12c   : > { %v261_v35 = vadd.f32 %v260_v33, %v259_v30 }
 0x12e   : > { %v263_v36 = vadd.f32 %v262_v34, %v261_v35  ;;  %v241_v37 = vpop.permute.xlu1 %240  ;;  %v243_v38 = vpop.permute.xlu0 %242 }
 0x12f   : > { %v264_v39 = vsel %vm254_vm4, %v241_v37, 0.0  ;;  %v266_v40 = vsel %vm254_vm4, %v243_v38, 0.0 }
 0x130   : > { %v265_v41 = vadd.f32 %v264_v39, %v263_v36 }
 0x132   : > { %v267_v42 = vadd.f32 %v266_v40, %v265_v41  ;;  %v245_v43 = vpop.permute.xlu1 %244 }
 0x133   : > { %v268_v44 = vsel %vm254_vm4, %v245_v43, 0.0 }
 0x134   : > { %v269_v45 = vadd.f32 %v268_v44, %v267_v42 }
 0x136   : > { %270 = vadd.xlane.f32.xlu0 %v269_v45 }
 0x171   : > { %v334_v46 = vpop.xlane.xlu1 %333 }
 0x172   : > { %v335_v47 = vrot.slane %v334_v46, 4 }
 0x174   : > { %v336_v48 = vadd.f32 %v335_v47, %v334_v46 }
 0x176   : > { %v337_v49 = vrot.slane %v336_v48, 2 }
 0x178   : > { %v338_v53 = vadd.f32 %v337_v49, %v336_v48 }
 0x17a   : > { %v339_v56 = vrot.slane %v338_v53, 1 }
 0x17c   : > { %v340_v59 = vadd.f32 %v339_v56, %v338_v53 }
 0x1c3   : > { %v271_v50 = vpop.xlane.xlu0 %270 }
 0x1c4   : > { %v272_v51 = vrot.slane %v271_v50, 4 }
 0x1c6   : > { %v273_v52 = vadd.f32 %v272_v51, %v271_v50 }
 0x1c8   : > { %v274_v54 = vrot.slane %v273_v52, 2 }
 0x1ca   : > { %v275_v55 = vadd.f32 %v274_v54, %v273_v52 }
 0x1cc   : > { %v276_v57 = vrot.slane %v275_v55, 1 }
 0x1ce   : > { %v277_v58 = vadd.f32 %v276_v57, %v275_v55 }
 0x1d0   : > { %453 = vpush %v277_v58 }
 0x1d1   : > { %455 = vpush %v340_v59 }
 0x201   : > { %s454_s28 = spop %453 }
 0x202   : > { %s456_s2 = spop %455 }
 0x203   : > { %s342_s5 = sadd.f32 %s456_s2, %s454_s28 }
 0x205   : > { %v350_v63 = vstv %s342_s5 }
 0x206   : > { %v351_v0 = vsel %vm349_vm7, %v350_v63, 0.0 }
 0x207   : > { %352 = vst [vmem:[%s135_s3] sm:$0xff] %v351_v0 }
 0x208   : > { %550 = shalt.err (!%p547_p2)
}
 0x209   : > { %s551_s23 = scalar_lea.hbm %s794_s14, 128  ;;  %s555_s30 = scalar_lea.hbm %s839_s1, 256 }
 0x20a   : > { %p552_p4 = scmp.ne.s32.totalorder %s794_s14, %s551_s23  ;;  %p556_p9 = scmp.lt.u32.totalorder %s794_s14, %s839_s1 }
 0x20b   : > { %p557_p1 = scmp.lt.u32.totalorder %s555_s30, %s551_s23  ;;  %p559_p6 = scmp.lt.u32.totalorder %s551_s23, %s794_s14 }
 0x20c   : > { %p553_p5 = pnand %p552_p4, %p846_p11 }
 0x20d   : > { %p558_p3 = por %p557_p1, %p556_p9 }
 0x20e   : > { %p554_p7 = pneg %p553_p5 }
 0x20f   : > { %p560_p12 = por %p559_p6, %p558_p3 }
 0x211   : > { %p561_p13 = pnand %p560_p12, %p554_p7 }
 0x213   : > { %564 = shalt.err (!%p561_p13)
}
 0x214   : > { %459 = dma.vmem_to_hbm [thread:$0]  (%p846_p11), %s796_s4, 128, %s794_s14, %s354_s16  }
 0x215 PF: > { %s379_s27 = sand.u32 1, %s591_s6   ;;  %p847_p8 = scmp.ne.s32.totalorder %s844_s19, 0 }
 0x216   : > { %p848_p10 = scmp.ge.s32.totalorder %s603_s9, 2  ;;  %s380_s28 = scalar_lea.sflag [#allocation4], %s379_s27 }
 0x218   : > { %p466_p0 = pnand %p848_p10, %p847_p8 }
 0x21a   : > { %586 = dma.done.wait (!%p466_p0), %s380_s28, 128  }
 0x21b   : > { %588 = vsyncadd (!%p466_p0), %s380_s28, 4294967168  ;;  %p14_p2 = scmp.ge.s32.totalorder %s646_s12, 4   ;;  %s849_s6 = smov %s595_s7 }
 0x21c   : > { %s850_s7 = smov %s599_s8  ;;  %s851_s8 = smov %s658_s15 }
 0x21d   : > { %s852_s9 = smov %s646_s12  ;;  %16 = sbr.rel (!%p14_p2) target bundleno = 5 (0x5), region = 69 }
 0x224   :  { %385 = vsyncpa [#allocation3], 1 }
 0x225   :  { %387 = vsyncpa [#allocation3 + $0x1], 1 }
 0x226   :  { %388 = vsyncpa [#allocation4], 1 }
 0x227   :  { %390 = vsyncpa [#allocation4 + $0x1], 1 }

</bundles_post_ra>
